<compile_context>
chip_gen: v6e
topology: v6e:2x2x1
jax: 0.10.0
libtpu: 0.0.40
codegen_flags: <defaults>
</compile_context>

<pallas_src>
import functools

import jax
import jax.numpy as jnp
from jax.experimental import pallas as pl
from jax.experimental.pallas import tpu as pltpu

PACK_W = 128        # lane width of padded fused heads / packed outputs
_MAX_TILE_B = 1024  # review: 512-1024 batch tiles amortize per-grid-step overhead


def _round_up(v, m):
    return -(-v // m) * m


def _argmax_lanes(x):
    """First-occurrence argmax along the last (lane) axis, keepdims=True."""
    m = jnp.max(x, axis=-1, keepdims=True)
    idx = jax.lax.broadcasted_iota(jnp.int32, x.shape, x.ndim - 1)
    sentinel = jnp.int32(x.shape[-1])
    return jnp.min(jnp.where(x == m, idx, sentinel), axis=-1, keepdims=True)


def _two_stage_fused_kernel(
    x_ref, w_ref, b_ref, ecls_ref, ereg_ref,   # inputs
    out_ref, ratio_ref,                        # outputs
    *, n_agents, num_classes, bs, tile_b,
):
    # ---- one fused MXU push for rejector | classifier_cls | classifier_reg ----
    logits = jnp.dot(x_ref[...], w_ref[...],
                     preferred_element_type=jnp.float32) + b_ref[...]

    # Lane iota reused everywhere; row/valid built from a (tile_b, 1) iota only.
    col = jax.lax.broadcasted_iota(jnp.int32, (1, PACK_W), 1)
    row = (jax.lax.broadcasted_iota(jnp.int32, (tile_b, 1), 0)
           + pl.program_id(0) * tile_b)
    valid = row < bs                                  # ragged-last-block row mask

    # ---- heads via full-width lane masks (no sub-128 lane slices) ----
    neg_inf = jnp.float32(-jnp.inf)
    c_lo = n_agents
    c_hi = n_agents + num_classes                     # regression lane index
    r_masked = jnp.where(col < n_agents, logits, neg_inf)
    selected = _argmax_lanes(r_masked)                # (tile_b, 1) agent id
    c_masked = jnp.where(jnp.logical_and(col >= c_lo, col < c_hi), logits, neg_inf)
    cls_pred = _argmax_lanes(c_masked) - c_lo         # (tile_b, 1) class id
    reg_pred = jnp.sum(jnp.where(col == c_hi, logits, jnp.float32(0.0)),
                       axis=-1, keepdims=True)        # (tile_b, 1) masked lane-select

    # ---- defer: classifier output iff rejector picked agent 0, else expert ----
    use_cls = selected == 0
    out_cls = jnp.where(use_cls, cls_pred, ecls_ref[...]).astype(jnp.float32)
    out_reg = jnp.where(use_cls, reg_pred, ereg_ref[...])

    # ---- lane-dense per-row slab: col0 = cls (as f32), col1 = reg, rest zero ----
    # TODO(synk): for very small feat the 512 B/row f32 writeback dominates; a
    # narrow (bs, 8) output (masked vst) could be measured as an alternative.
    out_ref[...] = jnp.where(col == 0, out_cls,
                             jnp.where(col == 1, out_reg, jnp.float32(0.0)))

    # ---- per-tile defer-ratio partial sums (no wrapper-side slab re-read) ----
    # Each hit contributes 1/(8*bs); the row is replicated over 8 sublanes so a
    # plain sum over all partial-output rows in the wrapper yields count/bs.
    hit = jnp.logical_and(col == selected, valid)
    counts = jnp.where(hit, jnp.float32(1.0 / (8.0 * bs)), jnp.float32(0.0))
    partial = jnp.sum(counts, axis=0, keepdims=True)  # (1, PACK_W) XLU reduction
    ratio_ref[...] = jnp.broadcast_to(partial, (8, PACK_W))


def _vmem_budget_bytes():
    """~75% of physical VMEM; conservative 48 MiB if the query is unavailable."""
    try:
        cap = pltpu.get_tpu_info().vmem_capacity_bytes
    except Exception:
        cap = 64 << 20   # v7x per-TensorCore physical (smallest of v5e/v6e/v7x)
    return int(cap * 0.75)


def two_stage_mimic_forward(x, expert_cls, expert_reg, params, *,
                            tile_b=None, matmul_dtype=jnp.bfloat16):
    """Returns (output_cls (bs,), output_reg (bs,1), defer_ratio (1+n_experts,))."""
    bs, feat = x.shape
    n_agents = params["w_rej"].shape[1]
    num_classes = params["w_cls"].shape[1]
    d_total = n_agents + num_classes + 1
    assert d_total <= PACK_W          # TODO(synk): support head widths > 128 lanes
    assert num_classes < (1 << 24)    # class ids travel through f32 lanes exactly

    # Fuse the three heads into one 128-lane-padded weight / bias (tiny; would
    # be precomputed once in real use).  bf16 x/W halve the dominant HBM read
    # and the x-tile VMEM footprint; accumulation stays f32 on the MXU.
    w_fused = jnp.concatenate(
        [params["w_rej"], params["w_cls"], params["w_reg"]], axis=1)
    b_fused = jnp.concatenate(
        [params["b_rej"], params["b_cls"], params["b_reg"]], axis=1)
    w_fused = jnp.pad(w_fused, ((0, 0), (0, PACK_W - d_total))).astype(matmul_dtype)
    b_fused = jnp.pad(b_fused, ((0, 0), (0, PACK_W - d_total))).astype(jnp.float32)
    x = x.astype(matmul_dtype)  # in real use x arrives bf16 / cast fuses upstream
    expert_cls = expert_cls.astype(jnp.int32)
    expert_reg = expert_reg.astype(jnp.float32)

    x_bytes = jnp.dtype(matmul_dtype).itemsize
    vmem_limit = _vmem_budget_bytes()

    # --- batch-tile heuristic sized against the per-chip VMEM budget ---
    # Resident fused W (+bias): count 2 copies in case single-buffering is
    # unavailable.  Per batch row: double-buffered x tile + expert inputs +
    # double-buffered per-row slab + headroom for f32 in-kernel intermediates.
    fixed = 2 * (feat * PACK_W * x_bytes + PACK_W * 4)
    per_row = 2 * feat * x_bytes + 2 * 2 * 4 + 2 * PACK_W * 4 + 6 * PACK_W * 4
    tile_cap = max(16, (vmem_limit - fixed) // per_row)
    # TODO(synk): if feat is so large that even tile_b=16 blows the budget, add
    # an 'arbitrary' K(feat) grid axis with an f32 VMEM accumulator.
    if tile_b is None:
        tile_b = min(_MAX_TILE_B, int(tile_cap))
        if bs >= 4 * 256:   # keep >= 4 grid steps (v7x megacore + pipeline depth)
            tile_b = min(tile_b, _round_up(pl.cdiv(bs, 4), 16))
        tile_b = min(tile_b, _round_up(bs, 16))
        tile_b = max(16, (tile_b // 16) * 16)   # bf16 sublane-pack friendly

    num_tiles = pl.cdiv(bs, tile_b)   # ragged last block -> no jnp.pad copy of x

    kernel = functools.partial(
        _two_stage_fused_kernel,
        n_agents=n_agents, num_classes=num_classes, bs=bs, tile_b=tile_b)

    def build(single_buffer_weights):
        w_kw = {"pipeline_mode": pl.Buffered(1)} if single_buffer_weights else {}
        return pl.pallas_call(
            kernel,
            grid=(num_tiles,),
            in_specs=[
                pl.BlockSpec((tile_b, feat), lambda i: (i, 0)),           # x: streamed
                pl.BlockSpec((feat, PACK_W), lambda i: (0, 0), **w_kw),   # W: resident
                pl.BlockSpec((1, PACK_W), lambda i: (0, 0), **w_kw),      # b: resident
                pl.BlockSpec((tile_b, 1), lambda i: (i, 0)),              # expert_cls
                pl.BlockSpec((tile_b, 1), lambda i: (i, 0)),              # expert_reg
            ],
            out_specs=(
                pl.BlockSpec((tile_b, PACK_W), lambda i: (i, 0)),         # per-row slab
                pl.BlockSpec((8, PACK_W), lambda i: (i, 0)),              # ratio partials
            ),
            out_shape=(
                jax.ShapeDtypeStruct((bs, PACK_W), jnp.float32),
                jax.ShapeDtypeStruct((num_tiles * 8, PACK_W), jnp.float32),
            ),
            compiler_params=pltpu.CompilerParams(
                dimension_semantics=("parallel",),
                vmem_limit_bytes=vmem_limit),
        )

    try:
        packed, partials = build(True)(x, w_fused, b_fused, expert_cls, expert_reg)
    except Exception:
        # pl.Buffered(1) (single-buffered resident weights) unsupported on this
        # jax/mosaic version -> default double buffering (already budgeted for).
        packed, partials = build(False)(x, w_fused, b_fused, expert_cls, expert_reg)

    output_cls = packed[:, 0].astype(jnp.int32)              # (bs,)
    output_reg = packed[:, 1:2]                              # (bs, 1)
    defer_ratio = jnp.sum(partials[:, :n_agents], axis=0)    # already scaled by 1/bs
    return output_cls, output_reg, defer_ratio


if __name__ == "__main__":
    # Small deterministic setup; bs=20 with tile_b=16 exercises a 2-step grid
    # with a ragged (masked) last block and the no-pad path.
    bs, feat_dim, num_classes, n_experts = 20, 32, 4, 3
    n_agents = 1 + n_experts

    key = jax.random.PRNGKey(0)
    ks = jax.random.split(key, 10)

    x = jax.random.normal(ks[0], (bs, feat_dim), dtype=jnp.float32)
    labels_class = jax.random.randint(ks[1], (bs,), 0, num_classes)   # unused by forward
    labels_reg = jax.random.normal(ks[2], (bs,), dtype=jnp.float32)   # unused by forward
    expert_cls = jax.random.randint(ks[3], (bs, 1), 0, num_classes).astype(jnp.int32)
    expert_reg = jax.random.normal(ks[4], (bs, 1), dtype=jnp.float32)

    params = {
        "w_rej": jax.random.normal(ks[5], (feat_dim, n_agents), dtype=jnp.float32) * 0.1,
        "b_rej": jnp.zeros((1, n_agents), dtype=jnp.float32),
        "w_cls": jax.random.normal(ks[6], (feat_dim, num_classes), dtype=jnp.float32) * 0.1,
        "b_cls": jnp.zeros((1, num_classes), dtype=jnp.float32),
        "w_reg": jax.random.normal(ks[7], (feat_dim, 1), dtype=jnp.float32) * 0.1,
        "b_reg": jnp.zeros((1, 1), dtype=jnp.float32),
    }

    out_a = two_stage_mimic_forward(x, expert_cls, expert_reg, params, tile_b=16)
    out_b = two_stage_mimic_forward(x, expert_cls, expert_reg, params)  # default tiling
    jax.block_until_ready((out_a, out_b))

    # Pure-JAX reference of the same semantics (softmaxes of the PyTorch module
    # are argmax-invariant and elided; same bf16-input / f32-accumulate matmul
    # path the kernel uses, so argmax results must match exactly).
    xb = x.astype(jnp.bfloat16)

    def head(w, b):
        return jnp.dot(xb, w.astype(jnp.bfloat16),
                       preferred_element_type=jnp.float32) + b

    sel = jnp.argmax(head(params["w_rej"], params["b_rej"]), axis=-1)
    c = jnp.argmax(head(params["w_cls"], params["b_cls"]), axis=-1)
    rg = head(params["w_reg"], params["b_reg"])
    ref_cls = jnp.where(sel == 0, c, expert_cls[:, 0]).astype(jnp.int32)
    ref_reg = jnp.where((sel == 0)[:, None], rg, expert_reg)
    ref_ratio = (jnp.sum(sel[:, None] == jnp.arange(n_agents)[None, :], axis=0)
                 / jnp.float32(bs))

    for (ocls, oreg, oratio) in (out_a, out_b):
        assert jnp.array_equal(ocls, ref_cls)
        assert jnp.allclose(oreg, ref_reg, atol=1e-4, rtol=1e-4)
        assert jnp.allclose(oratio, ref_ratio, atol=1e-5)

    print("KERNEL_OK")
</pallas_src>

<mosaic_0001>
module attributes {stable_mosaic.version = 11 : i64} {
  func.func @_two_stage_fused_kernel(%arg0: i32, %arg1: memref<16x32xbf16, #tpu.memory_space<vmem>>, %arg2: memref<32x128xbf16, #tpu.memory_space<vmem>>, %arg3: memref<1x128xf32, #tpu.memory_space<vmem>>, %arg4: memref<16x1xi32, #tpu.memory_space<vmem>>, %arg5: memref<16x1xf32, #tpu.memory_space<vmem>>, %arg6: memref<16x128xf32, #tpu.memory_space<vmem>>, %arg7: memref<8x128xf32, #tpu.memory_space<vmem>>) attributes {dimension_semantics = [#tpu.dimension_semantics<parallel>], iteration_bounds = array<i64: 2>, scalar_prefetch = 0 : i64, scratch_operands = 0 : i64, tpu.core_type = #tpu.core_type<tc>, window_params = [{transform_indices = @transform_0, window_bounds = array<i64: 16, 32>}, {pipeline_mode = #tpu.pipeline_mode<synchronous>, transform_indices = @transform_1, window_bounds = array<i64: 32, 128>}, {pipeline_mode = #tpu.pipeline_mode<synchronous>, transform_indices = @transform_2, window_bounds = array<i64: 1, 128>}, {transform_indices = @transform_3, window_bounds = array<i64: 16, 1>}, {transform_indices = @transform_4, window_bounds = array<i64: 16, 1>}, {transform_indices = @transform_5, window_bounds = array<i64: 16, 128>}, {transform_indices = @transform_6, window_bounds = array<i64: 8, 128>}]} {
    %c0 = arith.constant 0 : index
    %c0_0 = arith.constant 0 : index
    %0 = vector.load %arg1[%c0, %c0_0] : memref<16x32xbf16, #tpu.memory_space<vmem>>, vector<16x32xbf16>
    %c0_1 = arith.constant 0 : index
    %c0_2 = arith.constant 0 : index
    %1 = vector.load %arg2[%c0_1, %c0_2] : memref<32x128xbf16, #tpu.memory_space<vmem>>, vector<32x128xbf16>
    %cst = arith.constant dense<0.000000e+00> : vector<16x128xf32>
    %2 = tpu.matmul %0, %1, %cst {dimension_numbers = #tpu.dot_dimension_numbers<[1], [0], [0], [1], [0, 0, 1, 1], [], []>} : vector<16x32xbf16>, vector<32x128xbf16>, vector<16x128xf32> -> vector<16x128xf32>
    %c0_3 = arith.constant 0 : index
    %c0_4 = arith.constant 0 : index
    %3 = vector.load %arg3[%c0_3, %c0_4] : memref<1x128xf32, #tpu.memory_space<vmem>>, vector<1x128xf32>
    %4 = vector.broadcast %3 : vector<1x128xf32> to vector<16x128xf32>
    %5 = arith.addf %2, %4 : vector<16x128xf32>
    %6 = tpu.iota {dimensions = array<i32: 1>} : vector<1x128xi32>
    %7 = tpu.iota {dimensions = array<i32: 0>} : vector<16x1xi32>
    %c16_i32 = arith.constant 16 : i32
    %8 = arith.muli %arg0, %c16_i32 : i32
    %9 = vector.broadcast %8 : i32 to vector<16x1xi32>
    %10 = arith.addi %7, %9 : vector<16x1xi32>
    %c20_i32 = arith.constant 20 : i32
    %11 = vector.broadcast %c20_i32 : i32 to vector<16x1xi32>
    %12 = arith.cmpi slt, %10, %11 : vector<16x1xi32>
    %c4_i32 = arith.constant 4 : i32
    %13 = vector.broadcast %c4_i32 : i32 to vector<1x128xi32>
    %14 = arith.cmpi slt, %6, %13 : vector<1x128xi32>
    %cst_5 = arith.constant 0xFF800000 : f32
    %15 = vector.shape_cast %14 : vector<1x128xi1> to vector<1x128xi1>
    %16 = vector.broadcast %15 : vector<1x128xi1> to vector<16x128xi1>
    %17 = vector.broadcast %cst_5 : f32 to vector<16x128xf32>
    %18 = arith.select %16, %5, %17 : vector<16x128xi1>, vector<16x128xf32>
    %cst_6 = arith.constant dense<0xFF800000> : vector<16xf32>
    %19 = vector.multi_reduction <maximumf>, %18, %cst_6 [1] : vector<16x128xf32> to vector<16xf32>
    %20 = vector.shape_cast %19 : vector<16xf32> to vector<16x1xf32>
    %21 = tpu.iota {dimensions = array<i32: 1>} : vector<16x128xi32>
    %22 = vector.broadcast %20 : vector<16x1xf32> to vector<16x128xf32>
    %23 = arith.cmpf oeq, %18, %22 : vector<16x128xf32>
    %c128_i32 = arith.constant 128 : i32
    %24 = vector.broadcast %c128_i32 : i32 to vector<16x128xi32>
    %25 = arith.select %23, %21, %24 : vector<16x128xi1>, vector<16x128xi32>
    %cst_7 = arith.constant dense<2147483647> : vector<16xi32>
    %26 = vector.multi_reduction <minsi>, %25, %cst_7 [1] : vector<16x128xi32> to vector<16xi32>
    %27 = vector.shape_cast %26 : vector<16xi32> to vector<16x1xi32>
    %c4_i32_8 = arith.constant 4 : i32
    %28 = vector.broadcast %c4_i32_8 : i32 to vector<1x128xi32>
    %29 = arith.cmpi sge, %6, %28 : vector<1x128xi32>
    %c8_i32 = arith.constant 8 : i32
    %30 = vector.broadcast %c8_i32 : i32 to vector<1x128xi32>
    %31 = arith.cmpi slt, %6, %30 : vector<1x128xi32>
    %32 = arith.andi %29, %31 : vector<1x128xi1>
    %cst_9 = arith.constant 0xFF800000 : f32
    %33 = vector.shape_cast %32 : vector<1x128xi1> to vector<1x128xi1>
    %34 = vector.broadcast %33 : vector<1x128xi1> to vector<16x128xi1>
    %35 = vector.broadcast %cst_9 : f32 to vector<16x128xf32>
    %36 = arith.select %34, %5, %35 : vector<16x128xi1>, vector<16x128xf32>
    %cst_10 = arith.constant dense<0xFF800000> : vector<16xf32>
    %37 = vector.multi_reduction <maximumf>, %36, %cst_10 [1] : vector<16x128xf32> to vector<16xf32>
    %38 = vector.shape_cast %37 : vector<16xf32> to vector<16x1xf32>
    %39 = tpu.iota {dimensions = array<i32: 1>} : vector<16x128xi32>
    %40 = vector.broadcast %38 : vector<16x1xf32> to vector<16x128xf32>
    %41 = arith.cmpf oeq, %36, %40 : vector<16x128xf32>
    %c128_i32_11 = arith.constant 128 : i32
    %42 = vector.broadcast %c128_i32_11 : i32 to vector<16x128xi32>
    %43 = arith.select %41, %39, %42 : vector<16x128xi1>, vector<16x128xi32>
    %cst_12 = arith.constant dense<2147483647> : vector<16xi32>
    %44 = vector.multi_reduction <minsi>, %43, %cst_12 [1] : vector<16x128xi32> to vector<16xi32>
    %45 = vector.shape_cast %44 : vector<16xi32> to vector<16x1xi32>
    %c4_i32_13 = arith.constant 4 : i32
    %46 = vector.broadcast %c4_i32_13 : i32 to vector<16x1xi32>
    %47 = arith.subi %45, %46 : vector<16x1xi32>
    %c8_i32_14 = arith.constant 8 : i32
    %48 = vector.broadcast %c8_i32_14 : i32 to vector<1x128xi32>
    %49 = arith.cmpi eq, %6, %48 : vector<1x128xi32>
    %cst_15 = arith.constant 0.000000e+00 : f32
    %50 = vector.shape_cast %49 : vector<1x128xi1> to vector<1x128xi1>
    %51 = vector.broadcast %50 : vector<1x128xi1> to vector<16x128xi1>
    %52 = vector.broadcast %cst_15 : f32 to vector<16x128xf32>
    %53 = arith.select %51, %5, %52 : vector<16x128xi1>, vector<16x128xf32>
    %cst_16 = arith.constant dense<0.000000e+00> : vector<16xf32>
    %54 = vector.multi_reduction <add>, %53, %cst_16 [1] : vector<16x128xf32> to vector<16xf32>
    %55 = vector.shape_cast %54 : vector<16xf32> to vector<16x1xf32>
    %c0_i32 = arith.constant 0 : i32
    %56 = vector.broadcast %c0_i32 : i32 to vector<16x1xi32>
    %57 = arith.cmpi eq, %27, %56 : vector<16x1xi32>
    %c0_17 = arith.constant 0 : index
    %c0_18 = arith.constant 0 : index
    %58 = vector.load %arg4[%c0_17, %c0_18] : memref<16x1xi32, #tpu.memory_space<vmem>>, vector<16x1xi32>
    %59 = arith.select %57, %47, %58 : vector<16x1xi1>, vector<16x1xi32>
    %60 = arith.sitofp %59 : vector<16x1xi32> to vector<16x1xf32>
    %c0_19 = arith.constant 0 : index
    %c0_20 = arith.constant 0 : index
    %61 = vector.load %arg5[%c0_19, %c0_20] : memref<16x1xf32, #tpu.memory_space<vmem>>, vector<16x1xf32>
    %62 = arith.select %57, %55, %61 : vector<16x1xi1>, vector<16x1xf32>
    %c0_i32_21 = arith.constant 0 : i32
    %63 = vector.broadcast %c0_i32_21 : i32 to vector<1x128xi32>
    %64 = arith.cmpi eq, %6, %63 : vector<1x128xi32>
    %c1_i32 = arith.constant 1 : i32
    %65 = vector.broadcast %c1_i32 : i32 to vector<1x128xi32>
    %66 = arith.cmpi eq, %6, %65 : vector<1x128xi32>
    %cst_22 = arith.constant 0.000000e+00 : f32
    %67 = vector.shape_cast %66 : vector<1x128xi1> to vector<1x128xi1>
    %68 = vector.broadcast %67 : vector<1x128xi1> to vector<16x128xi1>
    %69 = vector.shape_cast %62 : vector<16x1xf32> to vector<16x1xf32>
    %70 = vector.broadcast %69 : vector<16x1xf32> to vector<16x128xf32>
    %71 = vector.broadcast %cst_22 : f32 to vector<16x128xf32>
    %72 = arith.select %68, %70, %71 : vector<16x128xi1>, vector<16x128xf32>
    %73 = vector.shape_cast %64 : vector<1x128xi1> to vector<1x128xi1>
    %74 = vector.broadcast %73 : vector<1x128xi1> to vector<16x128xi1>
    %75 = vector.shape_cast %60 : vector<16x1xf32> to vector<16x1xf32>
    %76 = vector.broadcast %75 : vector<16x1xf32> to vector<16x128xf32>
    %77 = arith.select %74, %76, %72 : vector<16x128xi1>, vector<16x128xf32>
    %c0_23 = arith.constant 0 : index
    %c0_24 = arith.constant 0 : index
    %78 = vector.load %arg6[%c0_23, %c0_24] : memref<16x128xf32, #tpu.memory_space<vmem>>, vector<16x128xf32>
    tpu.vector_store %arg6[%c0_23, %c0_24], %77 {strides = array<i32>} : memref<16x128xf32, #tpu.memory_space<vmem>>, vector<16x128xf32>,
    %79 = vector.broadcast %6 : vector<1x128xi32> to vector<16x128xi32>
    %80 = vector.broadcast %27 : vector<16x1xi32> to vector<16x128xi32>
    %81 = arith.cmpi eq, %79, %80 : vector<16x128xi32>
    %82 = vector.broadcast %12 : vector<16x1xi1> to vector<16x128xi1>
    %83 = arith.andi %81, %82 : vector<16x128xi1>
    %cst_25 = arith.constant 6.250000e-03 : f32
    %cst_26 = arith.constant 0.000000e+00 : f32
    %84 = vector.broadcast %cst_25 : f32 to vector<16x128xf32>
    %85 = vector.broadcast %cst_26 : f32 to vector<16x128xf32>
    %86 = arith.select %83, %84, %85 : vector<16x128xi1>, vector<16x128xf32>
    %cst_27 = arith.constant dense<0.000000e+00> : vector<128xf32>
    %87 = vector.multi_reduction <add>, %86, %cst_27 [0] : vector<16x128xf32> to vector<128xf32>
    %88 = vector.shape_cast %87 : vector<128xf32> to vector<1x128xf32>
    %89 = vector.shape_cast %88 : vector<1x128xf32> to vector<1x128xf32>
    %90 = vector.broadcast %89 : vector<1x128xf32> to vector<8x128xf32>
    %c0_28 = arith.constant 0 : index
    %c0_29 = arith.constant 0 : index
    %91 = vector.load %arg7[%c0_28, %c0_29] : memref<8x128xf32, #tpu.memory_space<vmem>>, vector<8x128xf32>
    tpu.vector_store %arg7[%c0_28, %c0_29], %90 {strides = array<i32>} : memref<8x128xf32, #tpu.memory_space<vmem>>, vector<8x128xf32>,
    return
  }
  func.func @transform_0(%arg0: i32) -> (i32, i32) {
    %c0_i32 = arith.constant 0 : i32
    %c0_i32_0 = arith.constant 0 : i32
    return %arg0, %c0_i32 : i32, i32
  }
  func.func @transform_1(%arg0: i32) -> (i32, i32) {
    %c0_i32 = arith.constant 0 : i32
    %c0_i32_0 = arith.constant 0 : i32
    %c0_i32_1 = arith.constant 0 : i32
    return %c0_i32, %c0_i32_0 : i32, i32
  }
  func.func @transform_2(%arg0: i32) -> (i32, i32) {
    %c0_i32 = arith.constant 0 : i32
    %c0_i32_0 = arith.constant 0 : i32
    %c0_i32_1 = arith.constant 0 : i32
    return %c0_i32, %c0_i32_0 : i32, i32
  }
  func.func @transform_3(%arg0: i32) -> (i32, i32) {
    %c0_i32 = arith.constant 0 : i32
    %c0_i32_0 = arith.constant 0 : i32
    return %arg0, %c0_i32 : i32, i32
  }
  func.func @transform_4(%arg0: i32) -> (i32, i32) {
    %c0_i32 = arith.constant 0 : i32
    %c0_i32_0 = arith.constant 0 : i32
    return %arg0, %c0_i32 : i32, i32
  }
  func.func @transform_5(%arg0: i32) -> (i32, i32) {
    %c0_i32 = arith.constant 0 : i32
    %c0_i32_0 = arith.constant 0 : i32
    return %arg0, %c0_i32 : i32, i32
  }
  func.func @transform_6(%arg0: i32) -> (i32, i32) {
    %c0_i32 = arith.constant 0 : i32
    %c0_i32_0 = arith.constant 0 : i32
    return %arg0, %c0_i32 : i32, i32
  }
}

module attributes {stable_mosaic.version = 11 : i64} {
  func.func @_two_stage_fused_kernel(%arg0: i32, %arg1: memref<16x32xbf16, #tpu.memory_space<vmem>>, %arg2: memref<32x128xbf16, #tpu.memory_space<vmem>>, %arg3: memref<1x128xf32, #tpu.memory_space<vmem>>, %arg4: memref<16x1xi32, #tpu.memory_space<vmem>>, %arg5: memref<16x1xf32, #tpu.memory_space<vmem>>, %arg6: memref<16x128xf32, #tpu.memory_space<vmem>>, %arg7: memref<8x128xf32, #tpu.memory_space<vmem>>) attributes {dimension_semantics = [#tpu.dimension_semantics<parallel>], iteration_bounds = array<i64: 2>, scalar_prefetch = 0 : i64, scratch_operands = 0 : i64, tpu.core_type = #tpu.core_type<tc>, window_params = [{transform_indices = @transform_0, window_bounds = array<i64: 16, 32>}, {pipeline_mode = #tpu.pipeline_mode<synchronous>, transform_indices = @transform_1, window_bounds = array<i64: 32, 128>}, {pipeline_mode = #tpu.pipeline_mode<synchronous>, transform_indices = @transform_2, window_bounds = array<i64: 1, 128>}, {transform_indices = @transform_3, window_bounds = array<i64: 16, 1>}, {transform_indices = @transform_4, window_bounds = array<i64: 16, 1>}, {transform_indices = @transform_5, window_bounds = array<i64: 16, 128>}, {transform_indices = @transform_6, window_bounds = array<i64: 8, 128>}]} {
    %c0 = arith.constant 0 : index
    %c0_0 = arith.constant 0 : index
    %0 = vector.load %arg1[%c0, %c0_0] : memref<16x32xbf16, #tpu.memory_space<vmem>>, vector<16x32xbf16>
    %c0_1 = arith.constant 0 : index
    %c0_2 = arith.constant 0 : index
    %1 = vector.load %arg2[%c0_1, %c0_2] : memref<32x128xbf16, #tpu.memory_space<vmem>>, vector<32x128xbf16>
    %cst = arith.constant dense<0.000000e+00> : vector<16x128xf32>
    %2 = tpu.matmul %0, %1, %cst {dimension_numbers = #tpu.dot_dimension_numbers<[1], [0], [0], [1], [0, 0, 1, 1], [], []>} : vector<16x32xbf16>, vector<32x128xbf16>, vector<16x128xf32> -> vector<16x128xf32>
    %c0_3 = arith.constant 0 : index
    %c0_4 = arith.constant 0 : index
    %3 = vector.load %arg3[%c0_3, %c0_4] : memref<1x128xf32, #tpu.memory_space<vmem>>, vector<1x128xf32>
    %4 = vector.broadcast %3 : vector<1x128xf32> to vector<16x128xf32>
    %5 = arith.addf %2, %4 : vector<16x128xf32>
    %6 = tpu.iota {dimensions = array<i32: 1>} : vector<1x128xi32>
    %7 = tpu.iota {dimensions = array<i32: 0>} : vector<16x1xi32>
    %c16_i32 = arith.constant 16 : i32
    %8 = arith.muli %arg0, %c16_i32 : i32
    %9 = vector.broadcast %8 : i32 to vector<16x1xi32>
    %10 = arith.addi %7, %9 : vector<16x1xi32>
    %c20_i32 = arith.constant 20 : i32
    %11 = vector.broadcast %c20_i32 : i32 to vector<16x1xi32>
    %12 = arith.cmpi slt, %10, %11 : vector<16x1xi32>
    %c4_i32 = arith.constant 4 : i32
    %13 = vector.broadcast %c4_i32 : i32 to vector<1x128xi32>
    %14 = arith.cmpi slt, %6, %13 : vector<1x128xi32>
    %cst_5 = arith.constant 0xFF800000 : f32
    %15 = vector.shape_cast %14 : vector<1x128xi1> to vector<1x128xi1>
    %16 = vector.broadcast %15 : vector<1x128xi1> to vector<16x128xi1>
    %17 = vector.broadcast %cst_5 : f32 to vector<16x128xf32>
    %18 = arith.select %16, %5, %17 : vector<16x128xi1>, vector<16x128xf32>
    %cst_6 = arith.constant dense<0xFF800000> : vector<16xf32>
    %19 = vector.multi_reduction <maximumf>, %18, %cst_6 [1] : vector<16x128xf32> to vector<16xf32>
    %20 = vector.shape_cast %19 : vector<16xf32> to vector<16x1xf32>
    %21 = tpu.iota {dimensions = array<i32: 1>} : vector<16x128xi32>
    %22 = vector.broadcast %20 : vector<16x1xf32> to vector<16x128xf32>
    %23 = arith.cmpf oeq, %18, %22 : vector<16x128xf32>
    %c128_i32 = arith.constant 128 : i32
    %24 = vector.broadcast %c128_i32 : i32 to vector<16x128xi32>
    %25 = arith.select %23, %21, %24 : vector<16x128xi1>, vector<16x128xi32>
    %cst_7 = arith.constant dense<2147483647> : vector<16xi32>
    %26 = vector.multi_reduction <minsi>, %25, %cst_7 [1] : vector<16x128xi32> to vector<16xi32>
    %27 = vector.shape_cast %26 : vector<16xi32> to vector<16x1xi32>
    %c4_i32_8 = arith.constant 4 : i32
    %28 = vector.broadcast %c4_i32_8 : i32 to vector<1x128xi32>
    %29 = arith.cmpi sge, %6, %28 : vector<1x128xi32>
    %c8_i32 = arith.constant 8 : i32
    %30 = vector.broadcast %c8_i32 : i32 to vector<1x128xi32>
    %31 = arith.cmpi slt, %6, %30 : vector<1x128xi32>
    %32 = arith.andi %29, %31 : vector<1x128xi1>
    %cst_9 = arith.constant 0xFF800000 : f32
    %33 = vector.shape_cast %32 : vector<1x128xi1> to vector<1x128xi1>
    %34 = vector.broadcast %33 : vector<1x128xi1> to vector<16x128xi1>
    %35 = vector.broadcast %cst_9 : f32 to vector<16x128xf32>
    %36 = arith.select %34, %5, %35 : vector<16x128xi1>, vector<16x128xf32>
    %cst_10 = arith.constant dense<0xFF800000> : vector<16xf32>
    %37 = vector.multi_reduction <maximumf>, %36, %cst_10 [1] : vector<16x128xf32> to vector<16xf32>
    %38 = vector.shape_cast %37 : vector<16xf32> to vector<16x1xf32>
    %39 = tpu.iota {dimensions = array<i32: 1>} : vector<16x128xi32>
    %40 = vector.broadcast %38 : vector<16x1xf32> to vector<16x128xf32>
    %41 = arith.cmpf oeq, %36, %40 : vector<16x128xf32>
    %c128_i32_11 = arith.constant 128 : i32
    %42 = vector.broadcast %c128_i32_11 : i32 to vector<16x128xi32>
    %43 = arith.select %41, %39, %42 : vector<16x128xi1>, vector<16x128xi32>
    %cst_12 = arith.constant dense<2147483647> : vector<16xi32>
    %44 = vector.multi_reduction <minsi>, %43, %cst_12 [1] : vector<16x128xi32> to vector<16xi32>
    %45 = vector.shape_cast %44 : vector<16xi32> to vector<16x1xi32>
    %c4_i32_13 = arith.constant 4 : i32
    %46 = vector.broadcast %c4_i32_13 : i32 to vector<16x1xi32>
    %47 = arith.subi %45, %46 : vector<16x1xi32>
    %c8_i32_14 = arith.constant 8 : i32
    %48 = vector.broadcast %c8_i32_14 : i32 to vector<1x128xi32>
    %49 = arith.cmpi eq, %6, %48 : vector<1x128xi32>
    %cst_15 = arith.constant 0.000000e+00 : f32
    %50 = vector.shape_cast %49 : vector<1x128xi1> to vector<1x128xi1>
    %51 = vector.broadcast %50 : vector<1x128xi1> to vector<16x128xi1>
    %52 = vector.broadcast %cst_15 : f32 to vector<16x128xf32>
    %53 = arith.select %51, %5, %52 : vector<16x128xi1>, vector<16x128xf32>
    %cst_16 = arith.constant dense<0.000000e+00> : vector<16xf32>
    %54 = vector.multi_reduction <add>, %53, %cst_16 [1] : vector<16x128xf32> to vector<16xf32>
    %55 = vector.shape_cast %54 : vector<16xf32> to vector<16x1xf32>
    %c0_i32 = arith.constant 0 : i32
    %56 = vector.broadcast %c0_i32 : i32 to vector<16x1xi32>
    %57 = arith.cmpi eq, %27, %56 : vector<16x1xi32>
    %c0_17 = arith.constant 0 : index
    %c0_18 = arith.constant 0 : index
    %58 = vector.load %arg4[%c0_17, %c0_18] : memref<16x1xi32, #tpu.memory_space<vmem>>, vector<16x1xi32>
    %59 = arith.select %57, %47, %58 : vector<16x1xi1>, vector<16x1xi32>
    %60 = arith.sitofp %59 : vector<16x1xi32> to vector<16x1xf32>
    %c0_19 = arith.constant 0 : index
    %c0_20 = arith.constant 0 : index
    %61 = vector.load %arg5[%c0_19, %c0_20] : memref<16x1xf32, #tpu.memory_space<vmem>>, vector<16x1xf32>
    %62 = arith.select %57, %55, %61 : vector<16x1xi1>, vector<16x1xf32>
    %c0_i32_21 = arith.constant 0 : i32
    %63 = vector.broadcast %c0_i32_21 : i32 to vector<1x128xi32>
    %64 = arith.cmpi eq, %6, %63 : vector<1x128xi32>
    %c1_i32 = arith.constant 1 : i32
    %65 = vector.broadcast %c1_i32 : i32 to vector<1x128xi32>
    %66 = arith.cmpi eq, %6, %65 : vector<1x128xi32>
    %cst_22 = arith.constant 0.000000e+00 : f32
    %67 = vector.shape_cast %66 : vector<1x128xi1> to vector<1x128xi1>
    %68 = vector.broadcast %67 : vector<1x128xi1> to vector<16x128xi1>
    %69 = vector.shape_cast %62 : vector<16x1xf32> to vector<16x1xf32>
    %70 = vector.broadcast %69 : vector<16x1xf32> to vector<16x128xf32>
    %71 = vector.broadcast %cst_22 : f32 to vector<16x128xf32>
    %72 = arith.select %68, %70, %71 : vector<16x128xi1>, vector<16x128xf32>
    %73 = vector.shape_cast %64 : vector<1x128xi1> to vector<1x128xi1>
    %74 = vector.broadcast %73 : vector<1x128xi1> to vector<16x128xi1>
    %75 = vector.shape_cast %60 : vector<16x1xf32> to vector<16x1xf32>
    %76 = vector.broadcast %75 : vector<16x1xf32> to vector<16x128xf32>
    %77 = arith.select %74, %76, %72 : vector<16x128xi1>, vector<16x128xf32>
    %c0_23 = arith.constant 0 : index
    %c0_24 = arith.constant 0 : index
    %78 = vector.load %arg6[%c0_23, %c0_24] : memref<16x128xf32, #tpu.memory_space<vmem>>, vector<16x128xf32>
    tpu.vector_store %arg6[%c0_23, %c0_24], %77 {strides = array<i32>} : memref<16x128xf32, #tpu.memory_space<vmem>>, vector<16x128xf32>,
    %79 = vector.broadcast %6 : vector<1x128xi32> to vector<16x128xi32>
    %80 = vector.broadcast %27 : vector<16x1xi32> to vector<16x128xi32>
    %81 = arith.cmpi eq, %79, %80 : vector<16x128xi32>
    %82 = vector.broadcast %12 : vector<16x1xi1> to vector<16x128xi1>
    %83 = arith.andi %81, %82 : vector<16x128xi1>
    %cst_25 = arith.constant 6.250000e-03 : f32
    %cst_26 = arith.constant 0.000000e+00 : f32
    %84 = vector.broadcast %cst_25 : f32 to vector<16x128xf32>
    %85 = vector.broadcast %cst_26 : f32 to vector<16x128xf32>
    %86 = arith.select %83, %84, %85 : vector<16x128xi1>, vector<16x128xf32>
    %cst_27 = arith.constant dense<0.000000e+00> : vector<128xf32>
    %87 = vector.multi_reduction <add>, %86, %cst_27 [0] : vector<16x128xf32> to vector<128xf32>
    %88 = vector.shape_cast %87 : vector<128xf32> to vector<1x128xf32>
    %89 = vector.shape_cast %88 : vector<1x128xf32> to vector<1x128xf32>
    %90 = vector.broadcast %89 : vector<1x128xf32> to vector<8x128xf32>
    %c0_28 = arith.constant 0 : index
    %c0_29 = arith.constant 0 : index
    %91 = vector.load %arg7[%c0_28, %c0_29] : memref<8x128xf32, #tpu.memory_space<vmem>>, vector<8x128xf32>
    tpu.vector_store %arg7[%c0_28, %c0_29], %90 {strides = array<i32>} : memref<8x128xf32, #tpu.memory_space<vmem>>, vector<8x128xf32>,
    return
  }
  func.func @transform_0(%arg0: i32) -> (i32, i32) {
    %c0_i32 = arith.constant 0 : i32
    %c0_i32_0 = arith.constant 0 : i32
    return %arg0, %c0_i32 : i32, i32
  }
  func.func @transform_1(%arg0: i32) -> (i32, i32) {
    %c0_i32 = arith.constant 0 : i32
    %c0_i32_0 = arith.constant 0 : i32
    %c0_i32_1 = arith.constant 0 : i32
    return %c0_i32, %c0_i32_0 : i32, i32
  }
  func.func @transform_2(%arg0: i32) -> (i32, i32) {
    %c0_i32 = arith.constant 0 : i32
    %c0_i32_0 = arith.constant 0 : i32
    %c0_i32_1 = arith.constant 0 : i32
    return %c0_i32, %c0_i32_0 : i32, i32
  }
  func.func @transform_3(%arg0: i32) -> (i32, i32) {
    %c0_i32 = arith.constant 0 : i32
    %c0_i32_0 = arith.constant 0 : i32
    return %arg0, %c0_i32 : i32, i32
  }
  func.func @transform_4(%arg0: i32) -> (i32, i32) {
    %c0_i32 = arith.constant 0 : i32
    %c0_i32_0 = arith.constant 0 : i32
    return %arg0, %c0_i32 : i32, i32
  }
  func.func @transform_5(%arg0: i32) -> (i32, i32) {
    %c0_i32 = arith.constant 0 : i32
    %c0_i32_0 = arith.constant 0 : i32
    return %arg0, %c0_i32 : i32, i32
  }
  func.func @transform_6(%arg0: i32) -> (i32, i32) {
    %c0_i32 = arith.constant 0 : i32
    %c0_i32_0 = arith.constant 0 : i32
    return %arg0, %c0_i32 : i32, i32
  }
}

</mosaic_0001>

<bundles_post_ra>
// kernel: tpu_custom_call.1
= control target key start
LH: loop header
LB: loop body
LE: loop exit
PB: predicated region body
PF: predicated region fallthrough
CT: control target
= control target key end

     0   :  { %s1195_s0 = inlined_call_operand.vmem [shape: bf16[20,32], index: 0, kind: input, shape index: {}]   ;;  %s1196_s1 = inlined_call_operand.vmem [shape: bf16[32,128], index: 1, kind: input, shape index: {}]   ;;  %s1197_s2 = inlined_call_operand.vmem [shape: f32[1,128], index: 2, kind: input, shape index: {}]   ;;  %s1198_s3 = inlined_call_operand.vmem [shape: s32[20,1], index: 3, kind: input, shape index: {}]   ;;  %s1199_s4 = inlined_call_operand.vmem [shape: f32[20,1], index: 4, kind: input, shape index: {}]   ;;  %s1200_s5 = inlined_call_operand.hbm [shape: f32[20,128], index: 5, kind: output, shape index: {0}]   ;;  %s1201_s6 = inlined_call_operand.hbm [shape: f32[16,128], index: 6, kind: output, shape index: {1}]  }
   0x1   :  { %1202 = sst [smem:[#allocation8_spill]] %s1195_s0 }
   0x2   :  { %12 = vsyncpa [#allocation3], 0 }
   0x3   :  { %14 = vsyncpa [#allocation3 + $0x1], 0 }
   0x4   :  { %15 = vsyncpa [#allocation5], 0 }
   0x5   :  { %17 = vsyncpa [#allocation5 + $0x1], 0  ;;  %s1002_s21 = smov 0   ;;  %s1004_s22 = smov 0  }
   0x6   :  { %s1006_s23 = smov 0   ;;  %s1008_s24 = smov 0  }
   0x7 LB: > { %s1023_s25 = sadd.s32 4294967295, %s958_s24   ;;  %s772_s26 = sadd.s32 4294967294, %s958_s24   ;;  %s958_s24 = sphi %s1008_s24, %s1210_s24   ;;  %s954_s23 = sphi %s1006_s23, %s1209_s23   ;;  %s950_s22 = sphi %s1004_s22, %s1208_s22   ;;  %s946_s21 = sphi %s1002_s21, %s1207_s21  }
   0x8   : > { %s1027_s27 = sadd.s32 1, %s958_s24   ;;  %s150_s28 = sadd.s32 1, %s954_s23 }
   0x9   : > { %s147_s29 = ssub.s32 %s958_s24, %s1027_s27  ;;  %p160_p0 = scmp.ne.s32.totalorder %s954_s23, %s950_s22 }
   0xa   : > { %p148_p1 = scmp.eq.s32.totalorder %s147_s29, 0  ;;  %p161_p2 = scmp.eq.s32.totalorder %s1023_s25, 1 }
   0xb   : > { %p166_p3 = scmp.ne.s32.totalorder %s950_s22, %s946_s21  ;;  %p167_p4 = scmp.eq.s32.totalorder %s772_s26, 1 }
   0xc   : > { %s1038_s30 = scalar_select %p148_p1, %s954_s23, %s150_s28  }
   0xd   : > { %p1040_p5 = por %p161_p2, %p160_p0  ;;  %p1044_p6 = por %p167_p4, %p166_p3 }
   0xe   : > { %p775_p7 = scmp.ge.s32.totalorder %s958_s24, 1  ;;  %p268_p8 = scmp.lt.s32.totalorder %s958_s24, 3 }
  0x10   : > { %p269_p9 = pnand %p775_p7, %p268_p8 }
  0x11   : > { %s1059_s13 = sshll.u32 (!%p269_p9), %s1023_s25, 1  ;;  %s1205_s0 = sld [smem:[#allocation8_spill]] (!%p269_p9) }
  0x12   : > { %272 = sbr.rel (%p269_p9) target bundleno = 847 (0x34f), region = 40  ;;  %p330_p10 = scmp.lt.s32.totalorder (!%p269_p9), %s1059_s13, 2 }
  0x13   : > { %s789_s26 = sshll.u32 (!%p269_p9), %s1023_s25, 4 }
  0x17   : > { %v865_v0 = vld [vmem:[%s1196_s1 + $0x8] sm:$0xff]   ;;  %v960_v1 = vmov 0.0   ;;  %v866_v2 = vld [vmem:[%s1196_s1] sm:$0xff]   ;;  %vm961_vm0 = vmmov 0   ;;  %s1064_s14 = scalar_select %p330_p10, %s1059_s13, 2  ;;  %vm403_vm1 = vcmask 261120   ;;  %v448_v4 = vlaneseq }
  0x18   : > { %807 = vmatprep.subr.bf16.mxu0 %v960_v1  ;;  %811 = vmatprep.mubr.msk.bf16.mxu0 %vm961_vm0, %v960_v1  ;;  %v784_v6 = vld [vmem:[%s1197_s2] ss:$0 sm:$0xff]  ;;  %v962_v51 = vmov 0   ;;  %v454_v58 = vstv %s789_s26 }
  0x19   : > { %808 = vmatpush3.bf16.msra.mxu0 %v865_v0  ;;  %s779_s15 = sshll.u32 %s1064_s14, 2  ;;  %v1071_v5 = vand.u32 127, %v448_v4  ;;  %863 = vset.pattern.permute.xlu0 %v962_v51  ;;  %v451_v56 = vshrl.u32 %v448_v4, 7  ;;  %s781_s28 = sshll.u32 %s1064_s14, 3 }
  0x1a   : > { %809 = vmatprep.subr.bf16.mxu0 %v960_v1  ;;  %s333_s18 = scalar_lea.vmem %s1205_s0, %s779_s15  ;;  %864 = vset.pattern.permute.xlu1 %v962_v51  ;;  %s1090_s10 = scalar_lea.vmem %s1198_s3, %s781_s28 }
  0x1b   : > { %v867_v3 = vld [vmem:[%s333_s18] sm:$0xff]   ;;  %vm500_vm2 = vcmp.ge.s32.totalorder %v1071_v5, 4  ;;  %vm501_vm3 = vcmp.lt.s32.totalorder %v1071_v5, 8  ;;  %vm459_vm5 = vcmp.lt.s32.totalorder %v1071_v5, 4  ;;  %vm545_vm13 = vcmp.eq.s32.totalorder %v1071_v5, 8  ;;  %s1095_s15 = scalar_lea.vmem %s1199_s4, %s781_s28  ;;  %s1101_s14 = sand.u32 1, %s950_s22  }
  0x1c   : > { %vm502_vm4 = vmand %vm500_vm2, %vm501_vm3  ;;  %v452_v59 = vadd.s32 8, %v451_v56  ;;  %s777_s16 = sshll.u32 %s1101_s14, 3  ;;  %s776_s18 = sshll.u32 %s1101_s14, 4 }
  0x1d   : > { %810 = vmatpush3.bf16.msra.mxu0 %v866_v2  ;;  %s1109_s17 = scalar_lea.vmem [#allocation4], %s777_s16  ;;  %s317_s19 = scalar_lea.vmem [#allocation2], %s776_s18 }
  0x1e   : > { %s617_s20 = scalar_lea.sflag [#allocation3], %s1101_s14  ;;  %s630_s28 = ssub.s32 (%p1040_p5), 3, %s1059_s13 }
  0x1f   : > { %p631_p11 = scmp.lt.s32.totalorder (%p1040_p5), %s630_s28, 2 }
  0x20   : > { %812 = vmatmul.mubr.msk.bf16.vlgmr.msra.gmra.mxu0 %vm403_vm1, %v867_v3  ;;  %v455_v3 = vadd.s32 %v454_v58, %v451_v56 }
  0x22   : > { %vm457_vm15 = vcmp.lt.s32.totalorder %v455_v3, 20 }
  0xe0   : > { %v441_v7 = vpop.f32.mrf.mxu0 }
  0xe1   : > { %v442_v8 = vadd.f32 %v784_v6, %v441_v7 }
  0xe2   : > { %v813_v9 = vpop.f32.mrf.mxu0 }
  0xe3   : > { %v505_v10 = vsel %vm502_vm4, %v442_v8, -inf  ;;  %v462_v11 = vsel %vm459_vm5, %v442_v8, -inf  ;;  %v548_v48 = vsel %vm545_vm13, %v442_v8, 0.0  ;;  %v456_v8 = vadd.s32 %v454_v58, %v452_v59  ;;  %v562_v9 = vld [vmem:[%s1095_s15] sm:$0xff] }
  0xe4   : > { %507 = vmax.xlane.f32.xlu0 %v505_v10  ;;  %464 = vmax.xlane.f32.xlu1 %v462_v11  ;;  %v444_v12 = vpop.f32.mrf.mxu0 }
  0xe5   : > { %v445_v13 = vadd.f32 %v784_v6, %v444_v12  ;;  %vm458_vm2 = vcmp.lt.s32.totalorder %v456_v8, 20 }
  0xe6   : > { %v814_v14 = vpop.f32.mrf.mxu0 }
  0xe7   : > { %v506_v15 = vsel %vm502_vm4, %v445_v13, -inf  ;;  %v463_v16 = vsel %vm459_vm5, %v445_v13, -inf  ;;  %v549_v50 = vsel %vm545_vm13, %v445_v13, 0.0 }
  0xe8   : > { %509 = vmax.xlane.f32.xlu0 %v506_v15  ;;  %466 = vmax.xlane.f32.xlu1 %v463_v16 }
 0x16d   : > { %v508_v17 = vpop.xlane.xlu0 %507  ;;  %v465_v18 = vpop.xlane.xlu1 %464 }
 0x16e   : > { %vm511_vm6 = vcmp.eq.f32.partialorder %v505_v10, %v508_v17  ;;  %vm468_vm7 = vcmp.eq.f32.partialorder %v462_v11, %v465_v18  ;;  %v556_v10 = vld [vmem:[%s1090_s10] sm:$0xff] }
 0x16f   : > { %v513_v19 = vsel %vm511_vm6, %v1071_v5, 128  ;;  %v470_v20 = vsel %vm468_vm7, %v1071_v5, 128  ;;  %vm567_vm7 = vcmp.eq.s32.totalorder %v1071_v5, 1 }
 0x170   : > { %v516_v21 = vshra.s32 %v513_v19, 16  ;;  %v473_v25 = vshra.s32 %v470_v20, 16  ;;  %v515_v33 = vand.u32 65535, %v513_v19  ;;  %v472_v34 = vand.u32 65535, %v470_v20 }
 0x171   : > { %v510_v22 = vpop.xlane.xlu0 %509  ;;  %v467_v23 = vpop.xlane.xlu1 %466 }
 0x172   : > { %vm512_vm8 = vcmp.eq.f32.partialorder %v506_v15, %v510_v22  ;;  %vm469_vm9 = vcmp.eq.f32.partialorder %v463_v16, %v467_v23  ;;  %v518_v24 = vcvt.s32.f32 %v516_v21  ;;  %v475_v29 = vcvt.s32.f32 %v473_v25  ;;  %v563_v23 = vld [vmem:[%s1095_s15 + $0x8] sm:$0xff] }
 0x173   : > { %v514_v26 = vsel %vm512_vm8, %v1071_v5, 128  ;;  %v471_v27 = vsel %vm469_vm9, %v1071_v5, 128  ;;  %v517_v37 = vcvt.s32.f32 %v515_v33  ;;  %v474_v42 = vcvt.s32.f32 %v472_v34 }
 0x174   : > { %519 = vmin.xlane.f32.xlu0 %v518_v24  ;;  %v530_v28 = vshra.s32 %v514_v26, 16  ;;  %v487_v31 = vshra.s32 %v471_v27, 16  ;;  %v529_v35 = vand.u32 65535, %v514_v26  ;;  %v486_v39 = vand.u32 65535, %v471_v27 }
 0x175   : > { %vm566_vm8 = vcmp.eq.s32.totalorder %v1071_v5, 0 }
 0x176   : > { %v532_v30 = vcvt.s32.f32 %v530_v28  ;;  %v489_v32 = vcvt.s32.f32 %v487_v31  ;;  %v531_v43 = vcvt.s32.f32 %v529_v35  ;;  %v488_v47 = vcvt.s32.f32 %v486_v39 }
 0x178   : > { %476 = vmin.xlane.f32.xlu0 %v475_v29  ;;  %533 = vmin.xlane.f32.xlu1 %v532_v30 }
 0x17c   : > { %490 = vmin.xlane.f32.xlu1 %v489_v32 }
 0x1fd   : > { %v520_v36 = vpop.xlane.xlu0 %519 }
 0x1fe   : > { %vm521_vm10 = vcmp.eq.f32.partialorder %v518_v24, %v520_v36  ;;  %v526_v52 = vcvt.f32.s32 %v520_v36  ;;  %v557_v24 = vld [vmem:[%s1090_s10 + $0x8] sm:$0xff] }
 0x1ff   : > { %v522_v38 = vsel %vm521_vm10, %v517_v37, inf }
 0x200   : > { %523 = vmin.xlane.f32.xlu0 %v522_v38  ;;  %v527_v57 = vshll.u32 %v526_v52, 16 }
 0x201   : > { %v477_v40 = vpop.xlane.xlu0 %476  ;;  %v534_v41 = vpop.xlane.xlu1 %533 }
 0x202   : > { %vm478_vm11 = vcmp.eq.f32.partialorder %v475_v29, %v477_v40  ;;  %vm535_vm12 = vcmp.eq.f32.partialorder %v532_v30, %v534_v41  ;;  %v483_v54 = vcvt.f32.s32 %v477_v40  ;;  %v540_v60 = vcvt.f32.s32 %v534_v41 }
 0x203   : > { %v479_v44 = vsel %vm478_vm11, %v474_v42, inf  ;;  %v536_v45 = vsel %vm535_vm12, %v531_v43, inf }
 0x204   : > { %480 = vmin.xlane.f32.xlu0 %v479_v44  ;;  %537 = vmin.xlane.f32.xlu1 %v536_v45  ;;  %v484_v2 = vshll.u32 %v483_v54, 16  ;;  %v541_v11 = vshll.u32 %v540_v60, 16 }
 0x205   : > { %v491_v46 = vpop.xlane.xlu1 %490 }
 0x206   : > { %vm492_vm14 = vcmp.eq.f32.partialorder %v489_v32, %v491_v46  ;;  %v497_v61 = vcvt.f32.s32 %v491_v46 }
 0x207   : > { %v493_v49 = vsel %vm492_vm14, %v488_v47, inf }
 0x208   : > { %550 = vadd.xlane.f32.xlu0 %v548_v48  ;;  %494 = vmin.xlane.f32.xlu1 %v493_v49  ;;  %v498_v12 = vshll.u32 %v497_v61, 16 }
 0x20c   : > { %552 = vadd.xlane.f32.xlu1 %v549_v50 }
 0x289   : > { %v524_v53 = vpop.xlane.xlu0 %523 }
 0x28a   : > { %v525_v55 = vcvt.f32.s32 %v524_v53 }
 0x28c   : > { %v528_v62 = vadd.s32 %v527_v57, %v525_v55 }
 0x28d   : > { %v481_v63 = vpop.xlane.xlu0 %480  ;;  %v538_v0 = vpop.xlane.xlu1 %537 }
 0x28e   : > { %v482_v4 = vcvt.f32.s32 %v481_v63  ;;  %v539_v6 = vcvt.f32.s32 %v538_v0  ;;  %v790_v13 = vadd.s32 4294967292, %v528_v62 }
 0x290   : > { %v485_v7 = vadd.s32 %v484_v2, %v482_v4  ;;  %v542_v17 = vadd.s32 %v541_v11, %v539_v6 }
 0x291   : > { %v551_v14 = vpop.xlane.xlu0 %550  ;;  %v495_v15 = vpop.xlane.xlu1 %494 }
 0x292   : > { %vm598_vm0 = vcmp.eq.s32.totalorder %v1071_v5, %v485_v7  ;;  %v496_v16 = vcvt.f32.s32 %v495_v15  ;;  %vm554_vm1 = vcmp.eq.s32.totalorder %v485_v7, 0  ;;  %v791_v25 = vadd.s32 4294967292, %v542_v17 }
 0x293   : > { %v564_v18 = vsel %vm554_vm1, %v551_v14, %v562_v9  ;;  %v558_v19 = vsel %vm554_vm1, %v790_v13, %v556_v10  ;;  %vm604_vm3 = vmand %vm598_vm0, %vm457_vm15 }
 0x294   : > { %v499_v20 = vadd.s32 %v498_v12, %v496_v16  ;;  %572 = vperm.xlu0 %863, %v564_v18   ;;  %v560_v21 = vcvt.s32.f32 %v558_v19  ;;  %v606_v26 = vsel %vm604_vm3, 0.00625, %v960_v1 }
 0x295   : > { %v553_v22 = vpop.xlane.xlu1 %552 }
 0x296   : > { %vm599_vm4 = vcmp.eq.s32.totalorder %v1071_v5, %v499_v20  ;;  %586 = vperm.xlu1 %864, %v560_v21   ;;  %vm555_vm5 = vcmp.eq.s32.totalorder %v499_v20, 0 }
 0x297   : > { %vm605_vm6 = vmand %vm599_vm4, %vm458_vm2  ;;  %v565_v29 = vsel %vm555_vm5, %v553_v22, %v563_v23  ;;  %v559_v30 = vsel %vm555_vm5, %v791_v25, %v557_v24 }
 0x298   : > { %v607_v27 = vsel %vm605_vm6, 0.00625, %v960_v1  ;;  %v561_v32 = vcvt.s32.f32 %v559_v30 }
 0x299   : > { %v608_v28 = vadd.f32 %v607_v27, %v606_v26 }
 0x29a   : > { %577 = vperm.xlu1 %864, %v565_v29  }
 0x29b   : > { %v609_v31 = vrot.slane %v608_v28, 4 }
 0x29d   : > { %v610_v33 = vadd.f32 %v609_v31, %v608_v28 }
 0x29e   : > { %591 = vperm.xlu1 %864, %v561_v32  }
 0x29f   : > { %v611_v34 = vrot.slane %v610_v33, 2 }
 0x2a1   : > { %v612_v35 = vadd.f32 %v611_v34, %v610_v33 }
 0x2a3   : > { %v613_v36 = vrot.slane %v612_v35, 1 }
 0x2a5   : > { %v614_v37 = vadd.f32 %v613_v36, %v612_v35 }
 0x2a7   : > { %615 = vst [vmem:[%s1109_s17] sm:$0xff] %v614_v37 }
 0x30f   : > { %v573_v1 = vpop.permute.xlu0 %572 }
 0x310   : > { %v580_v38 = vsel %vm567_vm7, %v573_v1, 0.0 }
 0x311   : > { %v587_v39 = vpop.permute.xlu1 %586 }
 0x312   : > { %v594_v40 = vsel %vm566_vm8, %v587_v39, %v580_v38 }
 0x313   : > { %596 = vst [vmem:[%s317_s19] sm:$0xff] %v594_v40 }
 0x315   : > { %v578_v41 = vpop.permute.xlu1 %577 }
 0x316   : > { %v581_v42 = vsel %vm567_vm7, %v578_v41, 0.0 }
 0x317   : > { %628 = sbr.rel (!%p1040_p5) target bundleno = 823 (0x337), region = 44 }
 0x319   : > { %v592_v43 = vpop.permute.xlu1 %591 }
 0x31a   : > { %v595_v44 = vsel %vm566_vm8, %v592_v43, %v581_v42 }
 0x31b   : > { %597 = vst [vmem:[%s317_s19 + $0x8] sm:$0xff] %v595_v44 }
 0x31c   : > { %s1212_s28 = smov (!%p631_p11, %s630_s28), 2 }
 0x31d   : > { %s1120_s29 = sshll.u32 %s1212_s28, 7 }
 0x31e   : > { %s635_s9 = ssub.s32 256, %s1120_s29 }
 0x31f   : > { %636 = vsyncadd %s617_s20, %s635_s9  ;;  %p796_p12 = scmp.ne.s32.totalorder %s1120_s29, 0  ;;  %s803_s10 = sshll.u32 %s1023_s25, 8 }
 0x320   : > { %s1130_s15 = scalar_lea.hbm %s1200_s5, %s803_s10  ;;  %s641_s13 = sshll.u32 %s317_s19, 4  ;;  %s1132_s13 = int_to_ptr.vmem [resolvable:$true] %s641_s13 }
 0x321   : > { %s868_s16 = scalar_lea.vmem %s1132_s13, %s1120_s29  ;;  %s963_s18 = smov [#allocation2]  }
 0x322   : > { %p869_p13 = scmp.ne.s32.totalorder %s1132_s13, %s868_s16  ;;  %s872_s28 = sshll.u32 %s963_s18, 4  ;;  %s873_s28 = int_to_ptr.vmem [resolvable:$false] %s872_s28 }
 0x323   : > { %s874_s9 = scalar_lea.vmem %s873_s28, 512  ;;  %p875_p2 = scmp.lt.s32.totalorder %s1132_s13, %s873_s28 }
 0x324   : > { %p870_p0 = pnand %p869_p13, %p796_p12  ;;  %p876_p3 = scmp.lt.s32.totalorder %s874_s9, %s868_s16 }
 0x326   : > { %p871_p1 = pneg %p870_p0  ;;  %p877_p4 = por %p876_p3, %p875_p2 }
 0x328   : > { %p878_p7 = pnand %p877_p4, %p871_p1 }
 0x32a   : > { %881 = shalt.err (!%p878_p7)
}
 0x32b   : > { %s882_s19 = scalar_lea.hbm %s1130_s15, %s1120_s29  ;;  %s886_s12 = scalar_lea.hbm %s1200_s5, 384 }
 0x32c   : > { %p883_p8 = scmp.ne.s32.totalorder %s1130_s15, %s882_s19  ;;  %p887_p11 = scmp.lt.s32.totalorder %s1130_s15, %s1200_s5 }
 0x32d   : > { %p888_p13 = scmp.lt.s32.totalorder %s886_s12, %s882_s19 }
 0x32e   : > { %p884_p9 = pnand %p883_p8, %p796_p12 }
 0x32f   : > { %p889_p0 = por %p888_p13, %p887_p11 }
 0x330   : > { %p885_p10 = pneg %p884_p9 }
 0x332   : > { %p890_p1 = pnand %p889_p0, %p885_p10 }
 0x334   : > { %893 = shalt.err (!%p890_p1)
}
 0x335   : > { %s964_s16 = smov 128   ;;  %s965_s9 = smov 8  }
 0x336   : > { %647 = dma.vmem_to_hbm [thread:$0]  (%p796_p12), %s1132_s13, %s1120_s29, %s1130_s15, %s617_s20, %s964_s16, %s964_s16, %s965_s9  }
 0x337 PF: > { %s800_s10 = sshll.u32 %s1023_s25, 7  ;;  %s657_s11 = sshll.u32 %s1109_s17, 4  ;;  %s658_s11 = int_to_ptr.vmem [resolvable:$true] %s657_s11 }
 0x338   : > { %s655_s18 = scalar_lea.hbm %s1201_s6, %s800_s10  ;;  %s894_s28 = scalar_lea.vmem %s658_s11, 128 }
 0x339   : > { %p895_p2 = scmp.ne.s32.totalorder %s658_s11, %s894_s28  ;;  %s966_s26 = smov [#allocation4]  }
 0x33a   : > { %s898_s0 = sshll.u32 %s966_s26, 4  ;;  %s899_s0 = int_to_ptr.vmem [resolvable:$false] %s898_s0 }
 0x33b   : > { %p896_p3 = pnand %p895_p2, %p1040_p5  ;;  %s900_s20 = scalar_lea.vmem %s899_s0, 256 }
 0x33c   : > { %p901_p12 = scmp.lt.s32.totalorder %s658_s11, %s899_s0  ;;  %p902_p7 = scmp.lt.s32.totalorder %s900_s20, %s894_s28 }
 0x33d   : > { %p897_p4 = pneg %p896_p3 }
 0x33e   : > { %p903_p8 = por %p902_p7, %p901_p12 }
 0x340   : > { %p904_p9 = pnand %p903_p8, %p897_p4 }
 0x342   : > { %907 = shalt.err (!%p904_p9)
}
 0x343   : > { %s908_s25 = scalar_lea.hbm %s655_s18, 128  ;;  %s912_s15 = scalar_lea.hbm %s1201_s6, 256 }
 0x344   : > { %p909_p10 = scmp.ne.s32.totalorder %s655_s18, %s908_s25  ;;  %p913_p0 = scmp.lt.s32.totalorder %s655_s18, %s1201_s6 }
 0x345   : > { %p914_p1 = scmp.lt.s32.totalorder %s912_s15, %s908_s25 }
 0x346   : > { %p910_p11 = pnand %p909_p10, %p1040_p5 }
 0x347   : > { %p915_p2 = por %p914_p1, %p913_p0 }
 0x348   : > { %p911_p13 = pneg %p910_p11 }
 0x34a   : > { %p916_p3 = pnand %p915_p2, %p911_p13 }
 0x34c   : > { %919 = shalt.err (!%p916_p3)
}
 0x34d   : > { %s1206_s0 = scalar_lea.sflag [#allocation5], %s1101_s14 }
 0x34e   : > { %815 = dma.vmem_to_hbm [thread:$0]  (%p1040_p5), %s658_s11, 128, %s655_s18, %s1206_s0  }
 0x34f PF: > { %p825_p4 = scmp.ge.s32.totalorder %s958_s24, 2  ;;  %s669_s26 = sand.u32 1, %s946_s21  }
 0x350   : > { %s670_s9 = scalar_lea.sflag [#allocation3], %s669_s26 }
 0x351   : > { %p819_p12 = pnand %p825_p4, %p1044_p6 }
 0x353   : > { %p820_p7 = pneg %p819_p12 }
 0x355   : > { %937 = dma.done.wait (%p820_p7), %s670_s9, 256  }
 0x356   : > { %939 = vsyncadd (%p820_p7), %s670_s9, 4294967040  ;;  %s679_s10 = scalar_lea.sflag [#allocation5], %s669_s26 }
 0x357   : > { %941 = dma.done.wait (%p820_p7), %s679_s10, 128  }
 0x358   : > { %943 = vsyncadd (%p820_p7), %s679_s10, 4294967168  ;;  %p20_p5 = scmp.ge.s32.totalorder %s1027_s27, 4   ;;  %s1207_s21 = smov %s950_s22 }
 0x359   : > { %s1208_s22 = smov %s954_s23  ;;  %s1209_s23 = smov %s1038_s30 }
 0x35a   : > { %s1210_s24 = smov %s1027_s27  ;;  %22 = sbr.rel (!%p20_p5) target bundleno = 7 (0x7), region = 98 }
 0x35f   :  { %684 = vsyncpa [#allocation3], 1 }
 0x360   :  { %686 = vsyncpa [#allocation3 + $0x1], 1 }
 0x361   :  { %687 = vsyncpa [#allocation5], 1 }
 0x362   :  { %689 = vsyncpa [#allocation5 + $0x1], 1 }

// kernel: tpu_custom_call.1
= control target key start
LH: loop header
LB: loop body
LE: loop exit
PB: predicated region body
PF: predicated region fallthrough
CT: control target
= control target key end

     0   :  { %s1195_s0 = inlined_call_operand.vmem [shape: bf16[20,32], index: 0, kind: input, shape index: {}]   ;;  %s1196_s1 = inlined_call_operand.vmem [shape: bf16[32,128], index: 1, kind: input, shape index: {}]   ;;  %s1197_s2 = inlined_call_operand.vmem [shape: f32[1,128], index: 2, kind: input, shape index: {}]   ;;  %s1198_s3 = inlined_call_operand.vmem [shape: s32[20,1], index: 3, kind: input, shape index: {}]   ;;  %s1199_s4 = inlined_call_operand.vmem [shape: f32[20,1], index: 4, kind: input, shape index: {}]   ;;  %s1200_s5 = inlined_call_operand.hbm [shape: f32[20,128], index: 5, kind: output, shape index: {0}]   ;;  %s1201_s6 = inlined_call_operand.hbm [shape: f32[16,128], index: 6, kind: output, shape index: {1}]  }
   0x1   :  { %1202 = sst [smem:[#allocation8_spill]] %s1195_s0 }
   0x2   :  { %12 = vsyncpa [#allocation3], 0 }
   0x3   :  { %14 = vsyncpa [#allocation3 + $0x1], 0 }
   0x4   :  { %15 = vsyncpa [#allocation5], 0 }
   0x5   :  { %17 = vsyncpa [#allocation5 + $0x1], 0  ;;  %s1002_s21 = smov 0   ;;  %s1004_s22 = smov 0  }
   0x6   :  { %s1006_s23 = smov 0   ;;  %s1008_s24 = smov 0  }
   0x7 LB: > { %s1023_s25 = sadd.s32 4294967295, %s958_s24   ;;  %s772_s26 = sadd.s32 4294967294, %s958_s24   ;;  %s958_s24 = sphi %s1008_s24, %s1210_s24   ;;  %s954_s23 = sphi %s1006_s23, %s1209_s23   ;;  %s950_s22 = sphi %s1004_s22, %s1208_s22   ;;  %s946_s21 = sphi %s1002_s21, %s1207_s21  }
   0x8   : > { %s1027_s27 = sadd.s32 1, %s958_s24   ;;  %s150_s28 = sadd.s32 1, %s954_s23 }
   0x9   : > { %s147_s29 = ssub.s32 %s958_s24, %s1027_s27  ;;  %p160_p0 = scmp.ne.s32.totalorder %s954_s23, %s950_s22 }
   0xa   : > { %p148_p1 = scmp.eq.s32.totalorder %s147_s29, 0  ;;  %p161_p2 = scmp.eq.s32.totalorder %s1023_s25, 1 }
   0xb   : > { %p166_p3 = scmp.ne.s32.totalorder %s950_s22, %s946_s21  ;;  %p167_p4 = scmp.eq.s32.totalorder %s772_s26, 1 }
   0xc   : > { %s1038_s30 = scalar_select %p148_p1, %s954_s23, %s150_s28  }
   0xd   : > { %p1040_p5 = por %p161_p2, %p160_p0  ;;  %p1044_p6 = por %p167_p4, %p166_p3 }
   0xe   : > { %p775_p7 = scmp.ge.s32.totalorder %s958_s24, 1  ;;  %p268_p8 = scmp.lt.s32.totalorder %s958_s24, 3 }
  0x10   : > { %p269_p9 = pnand %p775_p7, %p268_p8 }
  0x11   : > { %s1059_s13 = sshll.u32 (!%p269_p9), %s1023_s25, 1  ;;  %s1205_s0 = sld [smem:[#allocation8_spill]] (!%p269_p9) }
  0x12   : > { %272 = sbr.rel (%p269_p9) target bundleno = 847 (0x34f), region = 40  ;;  %p330_p10 = scmp.lt.s32.totalorder (!%p269_p9), %s1059_s13, 2 }
  0x13   : > { %s789_s26 = sshll.u32 (!%p269_p9), %s1023_s25, 4 }
  0x17   : > { %v865_v0 = vld [vmem:[%s1196_s1 + $0x8] sm:$0xff]   ;;  %v960_v1 = vmov 0.0   ;;  %v866_v2 = vld [vmem:[%s1196_s1] sm:$0xff]   ;;  %vm961_vm0 = vmmov 0   ;;  %s1064_s14 = scalar_select %p330_p10, %s1059_s13, 2  ;;  %vm403_vm1 = vcmask 261120   ;;  %v448_v4 = vlaneseq }
  0x18   : > { %807 = vmatprep.subr.bf16.mxu0 %v960_v1  ;;  %811 = vmatprep.mubr.msk.bf16.mxu0 %vm961_vm0, %v960_v1  ;;  %v784_v6 = vld [vmem:[%s1197_s2] ss:$0 sm:$0xff]  ;;  %v962_v51 = vmov 0   ;;  %v454_v58 = vstv %s789_s26 }
  0x19   : > { %808 = vmatpush3.bf16.msra.mxu0 %v865_v0  ;;  %s779_s15 = sshll.u32 %s1064_s14, 2  ;;  %v1071_v5 = vand.u32 127, %v448_v4  ;;  %863 = vset.pattern.permute.xlu0 %v962_v51  ;;  %v451_v56 = vshrl.u32 %v448_v4, 7  ;;  %s781_s28 = sshll.u32 %s1064_s14, 3 }
  0x1a   : > { %809 = vmatprep.subr.bf16.mxu0 %v960_v1  ;;  %s333_s18 = scalar_lea.vmem %s1205_s0, %s779_s15  ;;  %864 = vset.pattern.permute.xlu1 %v962_v51  ;;  %s1090_s10 = scalar_lea.vmem %s1198_s3, %s781_s28 }
  0x1b   : > { %v867_v3 = vld [vmem:[%s333_s18] sm:$0xff]   ;;  %vm500_vm2 = vcmp.ge.s32.totalorder %v1071_v5, 4  ;;  %vm501_vm3 = vcmp.lt.s32.totalorder %v1071_v5, 8  ;;  %vm459_vm5 = vcmp.lt.s32.totalorder %v1071_v5, 4  ;;  %vm545_vm13 = vcmp.eq.s32.totalorder %v1071_v5, 8  ;;  %s1095_s15 = scalar_lea.vmem %s1199_s4, %s781_s28  ;;  %s1101_s14 = sand.u32 1, %s950_s22  }
  0x1c   : > { %vm502_vm4 = vmand %vm500_vm2, %vm501_vm3  ;;  %v452_v59 = vadd.s32 8, %v451_v56  ;;  %s777_s16 = sshll.u32 %s1101_s14, 3  ;;  %s776_s18 = sshll.u32 %s1101_s14, 4 }
  0x1d   : > { %810 = vmatpush3.bf16.msra.mxu0 %v866_v2  ;;  %s1109_s17 = scalar_lea.vmem [#allocation4], %s777_s16  ;;  %s317_s19 = scalar_lea.vmem [#allocation2], %s776_s18 }
  0x1e   : > { %s617_s20 = scalar_lea.sflag [#allocation3], %s1101_s14  ;;  %s630_s28 = ssub.s32 (%p1040_p5), 3, %s1059_s13 }
  0x1f   : > { %p631_p11 = scmp.lt.s32.totalorder (%p1040_p5), %s630_s28, 2 }
  0x20   : > { %812 = vmatmul.mubr.msk.bf16.vlgmr.msra.gmra.mxu0 %vm403_vm1, %v867_v3  ;;  %v455_v3 = vadd.s32 %v454_v58, %v451_v56 }
  0x22   : > { %vm457_vm15 = vcmp.lt.s32.totalorder %v455_v3, 20 }
  0xe0   : > { %v441_v7 = vpop.f32.mrf.mxu0 }
  0xe1   : > { %v442_v8 = vadd.f32 %v784_v6, %v441_v7 }
  0xe2   : > { %v813_v9 = vpop.f32.mrf.mxu0 }
  0xe3   : > { %v505_v10 = vsel %vm502_vm4, %v442_v8, -inf  ;;  %v462_v11 = vsel %vm459_vm5, %v442_v8, -inf  ;;  %v548_v48 = vsel %vm545_vm13, %v442_v8, 0.0  ;;  %v456_v8 = vadd.s32 %v454_v58, %v452_v59  ;;  %v562_v9 = vld [vmem:[%s1095_s15] sm:$0xff] }
  0xe4   : > { %507 = vmax.xlane.f32.xlu0 %v505_v10  ;;  %464 = vmax.xlane.f32.xlu1 %v462_v11  ;;  %v444_v12 = vpop.f32.mrf.mxu0 }
  0xe5   : > { %v445_v13 = vadd.f32 %v784_v6, %v444_v12  ;;  %vm458_vm2 = vcmp.lt.s32.totalorder %v456_v8, 20 }
  0xe6   : > { %v814_v14 = vpop.f32.mrf.mxu0 }
  0xe7   : > { %v506_v15 = vsel %vm502_vm4, %v445_v13, -inf  ;;  %v463_v16 = vsel %vm459_vm5, %v445_v13, -inf  ;;  %v549_v50 = vsel %vm545_vm13, %v445_v13, 0.0 }
  0xe8   : > { %509 = vmax.xlane.f32.xlu0 %v506_v15  ;;  %466 = vmax.xlane.f32.xlu1 %v463_v16 }
 0x16d   : > { %v508_v17 = vpop.xlane.xlu0 %507  ;;  %v465_v18 = vpop.xlane.xlu1 %464 }
 0x16e   : > { %vm511_vm6 = vcmp.eq.f32.partialorder %v505_v10, %v508_v17  ;;  %vm468_vm7 = vcmp.eq.f32.partialorder %v462_v11, %v465_v18  ;;  %v556_v10 = vld [vmem:[%s1090_s10] sm:$0xff] }
 0x16f   : > { %v513_v19 = vsel %vm511_vm6, %v1071_v5, 128  ;;  %v470_v20 = vsel %vm468_vm7, %v1071_v5, 128  ;;  %vm567_vm7 = vcmp.eq.s32.totalorder %v1071_v5, 1 }
 0x170   : > { %v516_v21 = vshra.s32 %v513_v19, 16  ;;  %v473_v25 = vshra.s32 %v470_v20, 16  ;;  %v515_v33 = vand.u32 65535, %v513_v19  ;;  %v472_v34 = vand.u32 65535, %v470_v20 }
 0x171   : > { %v510_v22 = vpop.xlane.xlu0 %509  ;;  %v467_v23 = vpop.xlane.xlu1 %466 }
 0x172   : > { %vm512_vm8 = vcmp.eq.f32.partialorder %v506_v15, %v510_v22  ;;  %vm469_vm9 = vcmp.eq.f32.partialorder %v463_v16, %v467_v23  ;;  %v518_v24 = vcvt.s32.f32 %v516_v21  ;;  %v475_v29 = vcvt.s32.f32 %v473_v25  ;;  %v563_v23 = vld [vmem:[%s1095_s15 + $0x8] sm:$0xff] }
 0x173   : > { %v514_v26 = vsel %vm512_vm8, %v1071_v5, 128  ;;  %v471_v27 = vsel %vm469_vm9, %v1071_v5, 128  ;;  %v517_v37 = vcvt.s32.f32 %v515_v33  ;;  %v474_v42 = vcvt.s32.f32 %v472_v34 }
 0x174   : > { %519 = vmin.xlane.f32.xlu0 %v518_v24  ;;  %v530_v28 = vshra.s32 %v514_v26, 16  ;;  %v487_v31 = vshra.s32 %v471_v27, 16  ;;  %v529_v35 = vand.u32 65535, %v514_v26  ;;  %v486_v39 = vand.u32 65535, %v471_v27 }
 0x175   : > { %vm566_vm8 = vcmp.eq.s32.totalorder %v1071_v5, 0 }
 0x176   : > { %v532_v30 = vcvt.s32.f32 %v530_v28  ;;  %v489_v32 = vcvt.s32.f32 %v487_v31  ;;  %v531_v43 = vcvt.s32.f32 %v529_v35  ;;  %v488_v47 = vcvt.s32.f32 %v486_v39 }
 0x178   : > { %476 = vmin.xlane.f32.xlu0 %v475_v29  ;;  %533 = vmin.xlane.f32.xlu1 %v532_v30 }
 0x17c   : > { %490 = vmin.xlane.f32.xlu1 %v489_v32 }
 0x1fd   : > { %v520_v36 = vpop.xlane.xlu0 %519 }
 0x1fe   : > { %vm521_vm10 = vcmp.eq.f32.partialorder %v518_v24, %v520_v36  ;;  %v526_v52 = vcvt.f32.s32 %v520_v36  ;;  %v557_v24 = vld [vmem:[%s1090_s10 + $0x8] sm:$0xff] }
 0x1ff   : > { %v522_v38 = vsel %vm521_vm10, %v517_v37, inf }
 0x200   : > { %523 = vmin.xlane.f32.xlu0 %v522_v38  ;;  %v527_v57 = vshll.u32 %v526_v52, 16 }
 0x201   : > { %v477_v40 = vpop.xlane.xlu0 %476  ;;  %v534_v41 = vpop.xlane.xlu1 %533 }
 0x202   : > { %vm478_vm11 = vcmp.eq.f32.partialorder %v475_v29, %v477_v40  ;;  %vm535_vm12 = vcmp.eq.f32.partialorder %v532_v30, %v534_v41  ;;  %v483_v54 = vcvt.f32.s32 %v477_v40  ;;  %v540_v60 = vcvt.f32.s32 %v534_v41 }
 0x203   : > { %v479_v44 = vsel %vm478_vm11, %v474_v42, inf  ;;  %v536_v45 = vsel %vm535_vm12, %v531_v43, inf }
 0x204   : > { %480 = vmin.xlane.f32.xlu0 %v479_v44  ;;  %537 = vmin.xlane.f32.xlu1 %v536_v45  ;;  %v484_v2 = vshll.u32 %v483_v54, 16  ;;  %v541_v11 = vshll.u32 %v540_v60, 16 }
 0x205   : > { %v491_v46 = vpop.xlane.xlu1 %490 }
 0x206   : > { %vm492_vm14 = vcmp.eq.f32.partialorder %v489_v32, %v491_v46  ;;  %v497_v61 = vcvt.f32.s32 %v491_v46 }
 0x207   : > { %v493_v49 = vsel %vm492_vm14, %v488_v47, inf }
 0x208   : > { %550 = vadd.xlane.f32.xlu0 %v548_v48  ;;  %494 = vmin.xlane.f32.xlu1 %v493_v49  ;;  %v498_v12 = vshll.u32 %v497_v61, 16 }
 0x20c   : > { %552 = vadd.xlane.f32.xlu1 %v549_v50 }
 0x289   : > { %v524_v53 = vpop.xlane.xlu0 %523 }
 0x28a   : > { %v525_v55 = vcvt.f32.s32 %v524_v53 }
 0x28c   : > { %v528_v62 = vadd.s32 %v527_v57, %v525_v55 }
 0x28d   : > { %v481_v63 = vpop.xlane.xlu0 %480  ;;  %v538_v0 = vpop.xlane.xlu1 %537 }
 0x28e   : > { %v482_v4 = vcvt.f32.s32 %v481_v63  ;;  %v539_v6 = vcvt.f32.s32 %v538_v0  ;;  %v790_v13 = vadd.s32 4294967292, %v528_v62 }
 0x290   : > { %v485_v7 = vadd.s32 %v484_v2, %v482_v4  ;;  %v542_v17 = vadd.s32 %v541_v11, %v539_v6 }
 0x291   : > { %v551_v14 = vpop.xlane.xlu0 %550  ;;  %v495_v15 = vpop.xlane.xlu1 %494 }
 0x292   : > { %vm598_vm0 = vcmp.eq.s32.totalorder %v1071_v5, %v485_v7  ;;  %v496_v16 = vcvt.f32.s32 %v495_v15  ;;  %vm554_vm1 = vcmp.eq.s32.totalorder %v485_v7, 0  ;;  %v791_v25 = vadd.s32 4294967292, %v542_v17 }
 0x293   : > { %v564_v18 = vsel %vm554_vm1, %v551_v14, %v562_v9  ;;  %v558_v19 = vsel %vm554_vm1, %v790_v13, %v556_v10  ;;  %vm604_vm3 = vmand %vm598_vm0, %vm457_vm15 }
 0x294   : > { %v499_v20 = vadd.s32 %v498_v12, %v496_v16  ;;  %572 = vperm.xlu0 %863, %v564_v18   ;;  %v560_v21 = vcvt.s32.f32 %v558_v19  ;;  %v606_v26 = vsel %vm604_vm3, 0.00625, %v960_v1 }
 0x295   : > { %v553_v22 = vpop.xlane.xlu1 %552 }
 0x296   : > { %vm599_vm4 = vcmp.eq.s32.totalorder %v1071_v5, %v499_v20  ;;  %586 = vperm.xlu1 %864, %v560_v21   ;;  %vm555_vm5 = vcmp.eq.s32.totalorder %v499_v20, 0 }
 0x297   : > { %vm605_vm6 = vmand %vm599_vm4, %vm458_vm2  ;;  %v565_v29 = vsel %vm555_vm5, %v553_v22, %v563_v23  ;;  %v559_v30 = vsel %vm555_vm5, %v791_v25, %v557_v24 }
 0x298   : > { %v607_v27 = vsel %vm605_vm6, 0.00625, %v960_v1  ;;  %v561_v32 = vcvt.s32.f32 %v559_v30 }
 0x299   : > { %v608_v28 = vadd.f32 %v607_v27, %v606_v26 }
 0x29a   : > { %577 = vperm.xlu1 %864, %v565_v29  }
 0x29b   : > { %v609_v31 = vrot.slane %v608_v28, 4 }
 0x29d   : > { %v610_v33 = vadd.f32 %v609_v31, %v608_v28 }
 0x29e   : > { %591 = vperm.xlu1 %864, %v561_v32  }
 0x29f   : > { %v611_v34 = vrot.slane %v610_v33, 2 }
 0x2a1   : > { %v612_v35 = vadd.f32 %v611_v34, %v610_v33 }
 0x2a3   : > { %v613_v36 = vrot.slane %v612_v35, 1 }
 0x2a5   : > { %v614_v37 = vadd.f32 %v613_v36, %v612_v35 }
 0x2a7   : > { %615 = vst [vmem:[%s1109_s17] sm:$0xff] %v614_v37 }
 0x30f   : > { %v573_v1 = vpop.permute.xlu0 %572 }
 0x310   : > { %v580_v38 = vsel %vm567_vm7, %v573_v1, 0.0 }
 0x311   : > { %v587_v39 = vpop.permute.xlu1 %586 }
 0x312   : > { %v594_v40 = vsel %vm566_vm8, %v587_v39, %v580_v38 }
 0x313   : > { %596 = vst [vmem:[%s317_s19] sm:$0xff] %v594_v40 }
 0x315   : > { %v578_v41 = vpop.permute.xlu1 %577 }
 0x316   : > { %v581_v42 = vsel %vm567_vm7, %v578_v41, 0.0 }
 0x317   : > { %628 = sbr.rel (!%p1040_p5) target bundleno = 823 (0x337), region = 44 }
 0x319   : > { %v592_v43 = vpop.permute.xlu1 %591 }
 0x31a   : > { %v595_v44 = vsel %vm566_vm8, %v592_v43, %v581_v42 }
 0x31b   : > { %597 = vst [vmem:[%s317_s19 + $0x8] sm:$0xff] %v595_v44 }
 0x31c   : > { %s1212_s28 = smov (!%p631_p11, %s630_s28), 2 }
 0x31d   : > { %s1120_s29 = sshll.u32 %s1212_s28, 7 }
 0x31e   : > { %s635_s9 = ssub.s32 256, %s1120_s29 }
 0x31f   : > { %636 = vsyncadd %s617_s20, %s635_s9  ;;  %p796_p12 = scmp.ne.s32.totalorder %s1120_s29, 0  ;;  %s803_s10 = sshll.u32 %s1023_s25, 8 }
 0x320   : > { %s1130_s15 = scalar_lea.hbm %s1200_s5, %s803_s10  ;;  %s641_s13 = sshll.u32 %s317_s19, 4  ;;  %s1132_s13 = int_to_ptr.vmem [resolvable:$true] %s641_s13 }
 0x321   : > { %s868_s16 = scalar_lea.vmem %s1132_s13, %s1120_s29  ;;  %s963_s18 = smov [#allocation2]  }
 0x322   : > { %p869_p13 = scmp.ne.s32.totalorder %s1132_s13, %s868_s16  ;;  %s872_s28 = sshll.u32 %s963_s18, 4  ;;  %s873_s28 = int_to_ptr.vmem [resolvable:$false] %s872_s28 }
 0x323   : > { %s874_s9 = scalar_lea.vmem %s873_s28, 512  ;;  %p875_p2 = scmp.lt.s32.totalorder %s1132_s13, %s873_s28 }
 0x324   : > { %p870_p0 = pnand %p869_p13, %p796_p12  ;;  %p876_p3 = scmp.lt.s32.totalorder %s874_s9, %s868_s16 }
 0x326   : > { %p871_p1 = pneg %p870_p0  ;;  %p877_p4 = por %p876_p3, %p875_p2 }
 0x328   : > { %p878_p7 = pnand %p877_p4, %p871_p1 }
 0x32a   : > { %881 = shalt.err (!%p878_p7)
}
 0x32b   : > { %s882_s19 = scalar_lea.hbm %s1130_s15, %s1120_s29  ;;  %s886_s12 = scalar_lea.hbm %s1200_s5, 384 }
 0x32c   : > { %p883_p8 = scmp.ne.s32.totalorder %s1130_s15, %s882_s19  ;;  %p887_p11 = scmp.lt.s32.totalorder %s1130_s15, %s1200_s5 }
 0x32d   : > { %p888_p13 = scmp.lt.s32.totalorder %s886_s12, %s882_s19 }
 0x32e   : > { %p884_p9 = pnand %p883_p8, %p796_p12 }
 0x32f   : > { %p889_p0 = por %p888_p13, %p887_p11 }
 0x330   : > { %p885_p10 = pneg %p884_p9 }
 0x332   : > { %p890_p1 = pnand %p889_p0, %p885_p10 }
 0x334   : > { %893 = shalt.err (!%p890_p1)
}
 0x335   : > { %s964_s16 = smov 128   ;;  %s965_s9 = smov 8  }
 0x336   : > { %647 = dma.vmem_to_hbm [thread:$0]  (%p796_p12), %s1132_s13, %s1120_s29, %s1130_s15, %s617_s20, %s964_s16, %s964_s16, %s965_s9  }
 0x337 PF: > { %s800_s10 = sshll.u32 %s1023_s25, 7  ;;  %s657_s11 = sshll.u32 %s1109_s17, 4  ;;  %s658_s11 = int_to_ptr.vmem [resolvable:$true] %s657_s11 }
 0x338   : > { %s655_s18 = scalar_lea.hbm %s1201_s6, %s800_s10  ;;  %s894_s28 = scalar_lea.vmem %s658_s11, 128 }
 0x339   : > { %p895_p2 = scmp.ne.s32.totalorder %s658_s11, %s894_s28  ;;  %s966_s26 = smov [#allocation4]  }
 0x33a   : > { %s898_s0 = sshll.u32 %s966_s26, 4  ;;  %s899_s0 = int_to_ptr.vmem [resolvable:$false] %s898_s0 }
 0x33b   : > { %p896_p3 = pnand %p895_p2, %p1040_p5  ;;  %s900_s20 = scalar_lea.vmem %s899_s0, 256 }
 0x33c   : > { %p901_p12 = scmp.lt.s32.totalorder %s658_s11, %s899_s0  ;;  %p902_p7 = scmp.lt.s32.totalorder %s900_s20, %s894_s28 }
 0x33d   : > { %p897_p4 = pneg %p896_p3 }
 0x33e   : > { %p903_p8 = por %p902_p7, %p901_p12 }
 0x340   : > { %p904_p9 = pnand %p903_p8, %p897_p4 }
 0x342   : > { %907 = shalt.err (!%p904_p9)
}
 0x343   : > { %s908_s25 = scalar_lea.hbm %s655_s18, 128  ;;  %s912_s15 = scalar_lea.hbm %s1201_s6, 256 }
 0x344   : > { %p909_p10 = scmp.ne.s32.totalorder %s655_s18, %s908_s25  ;;  %p913_p0 = scmp.lt.s32.totalorder %s655_s18, %s1201_s6 }
 0x345   : > { %p914_p1 = scmp.lt.s32.totalorder %s912_s15, %s908_s25 }
 0x346   : > { %p910_p11 = pnand %p909_p10, %p1040_p5 }
 0x347   : > { %p915_p2 = por %p914_p1, %p913_p0 }
 0x348   : > { %p911_p13 = pneg %p910_p11 }
 0x34a   : > { %p916_p3 = pnand %p915_p2, %p911_p13 }
 0x34c   : > { %919 = shalt.err (!%p916_p3)
}
 0x34d   : > { %s1206_s0 = scalar_lea.sflag [#allocation5], %s1101_s14 }
 0x34e   : > { %815 = dma.vmem_to_hbm [thread:$0]  (%p1040_p5), %s658_s11, 128, %s655_s18, %s1206_s0  }
 0x34f PF: > { %p825_p4 = scmp.ge.s32.totalorder %s958_s24, 2  ;;  %s669_s26 = sand.u32 1, %s946_s21  }
 0x350   : > { %s670_s9 = scalar_lea.sflag [#allocation3], %s669_s26 }
 0x351   : > { %p819_p12 = pnand %p825_p4, %p1044_p6 }
 0x353   : > { %p820_p7 = pneg %p819_p12 }
 0x355   : > { %937 = dma.done.wait (%p820_p7), %s670_s9, 256  }
 0x356   : > { %939 = vsyncadd (%p820_p7), %s670_s9, 4294967040  ;;  %s679_s10 = scalar_lea.sflag [#allocation5], %s669_s26 }
 0x357   : > { %941 = dma.done.wait (%p820_p7), %s679_s10, 128  }
 0x358   : > { %943 = vsyncadd (%p820_p7), %s679_s10, 4294967168  ;;  %p20_p5 = scmp.ge.s32.totalorder %s1027_s27, 4   ;;  %s1207_s21 = smov %s950_s22 }
 0x359   : > { %s1208_s22 = smov %s954_s23  ;;  %s1209_s23 = smov %s1038_s30 }
 0x35a   : > { %s1210_s24 = smov %s1027_s27  ;;  %22 = sbr.rel (!%p20_p5) target bundleno = 7 (0x7), region = 98 }
 0x35f   :  { %684 = vsyncpa [#allocation3], 1 }
 0x360   :  { %686 = vsyncpa [#allocation3 + $0x1], 1 }
 0x361   :  { %687 = vsyncpa [#allocation5], 1 }
 0x362   :  { %689 = vsyncpa [#allocation5 + $0x1], 1 }

</bundles_post_ra>
